<compile_context>
chip_gen: v5e
topology: v5e:2x2
jax: 0.10.0
libtpu: 0.0.40
codegen_flags: <defaults>
</compile_context>

<pallas_src>
import jax
import jax.numpy as jnp
from jax.experimental import pallas as pl
from jax.experimental.pallas import tpu as pltpu


def _variational_dropout_kernel(mask_ref, x_ref, o_ref):
    # mask_ref: (1, B*H) already scaled by 1/keep_prob (0 or 1/keep).
    # x_ref / o_ref: (tT, B*H) tile of the flattened activations.
    o_ref[...] = x_ref[...] * mask_ref[...]


def variational_dropout(x: jax.Array,
                        dropout: float,
                        key: jax.Array,
                        training: bool = True,
                        *,
                        block_t: int | None = None) -> jax.Array:
    """Pallas implementation of VariationalDropout.forward.

    x: (T, B, H) = (seq_len, batch, hidden), matching the PyTorch layout.
    """
    if (not training) or dropout <= 0.0:
        return x

    T, B, H = x.shape
    BH = B * H
    keep_prob = 1.0 - float(dropout)

    # One locked Bernoulli(keep_prob) mask per (batch, hidden), shared across
    # all T time-steps; fold the 1/keep_prob rescale into the mask once.
    keep = jax.random.bernoulli(key, p=keep_prob, shape=(B, H))
    mask_scaled = jnp.where(
        keep,
        jnp.asarray(1.0 / keep_prob, dtype=x.dtype),
        jnp.asarray(0.0, dtype=x.dtype),
    ).reshape(1, BH)

    # Lane-dense 2-D view of the activations.
    x2 = x.reshape(T, BH)

    # Pick a T tile: biggest tile with ~4 MiB per buffer (input + output are
    # each double-buffered -> ~16 MiB live), safe for v7x's 64 MiB VMEM and
    # large enough (>=512 rows when rows are small) to hit HBM roofline on
    # v5e/v6e.  Keep the sublane dim a multiple of 8 unless it spans all of T.
    if block_t is None:
        itemsize = jnp.dtype(x.dtype).itemsize
        rows = max(1, (4 * 1024 * 1024) // max(1, BH * itemsize))
        if rows >= T:
            block_t = T
        else:
            block_t = max(8, (rows // 8) * 8)

    grid = (pl.cdiv(T, block_t),)

    out2 = pl.pallas_call(
        _variational_dropout_kernel,
        grid=grid,
        in_specs=[
            # Same (1, B*H) mask block for every grid step (stays resident).
            pl.BlockSpec((1, BH), lambda t: (0, 0)),
            # Stream T tiles of the activations.
            pl.BlockSpec((block_t, BH), lambda t: (t, 0)),
        ],
        out_specs=pl.BlockSpec((block_t, BH), lambda t: (t, 0)),
        out_shape=jax.ShapeDtypeStruct((T, BH), x.dtype),
        compiler_params=pltpu.CompilerParams(
            dimension_semantics=("parallel",)),
    )(mask_scaled, x2)

    return out2.reshape(T, B, H)


if __name__ == "__main__":
    # Small shapes consistent with the module's (seq, batch, hidden) usage.
    T, B, H = 8, 2, 32
    dropout_p = 0.5

    root = jax.random.PRNGKey(0)
    k_data, k_mask = jax.random.split(root)
    x = jax.random.normal(k_data, (T, B, H), dtype=jnp.float32)

    out = variational_dropout(x, dropout_p, key=k_mask, training=True)
    out = jax.block_until_ready(out)

    # Sanity: every output element is either 0 or x/(1-p), and the mask is
    # shared across the time dimension (variational / locked dropout).
    scaled = x / (1.0 - dropout_p)
    is_zero = jnp.isclose(out, 0.0)
    is_scaled = jnp.isclose(out, scaled, rtol=1e-5, atol=1e-5)
    assert bool(jnp.all(is_zero | is_scaled)), "output not in {0, x/keep_prob}"
    mask_per_t = ~is_zero  # (T, B, H) boolean
    assert bool(jnp.all(mask_per_t == mask_per_t[0:1])), "mask varies across time"

    # Eval mode / p<=0 is the identity.
    out_eval = jax.block_until_ready(
        variational_dropout(x, dropout_p, key=k_mask, training=False))
    assert bool(jnp.all(out_eval == x))
    out_p0 = jax.block_until_ready(
        variational_dropout(x, 0.0, key=k_mask, training=True))
    assert bool(jnp.all(out_p0 == x))

    print("KERNEL_OK")
</pallas_src>

<mosaic_0001>
module attributes {stable_mosaic.version = 11 : i64} {
  func.func @_variational_dropout_kernel(%arg0: i32, %arg1: memref<1x64xf32, #tpu.memory_space<vmem>>, %arg2: memref<8x64xf32, #tpu.memory_space<vmem>>, %arg3: memref<8x64xf32, #tpu.memory_space<vmem>>) attributes {dimension_semantics = [#tpu.dimension_semantics<parallel>], iteration_bounds = array<i64: 1>, scalar_prefetch = 0 : i64, scratch_operands = 0 : i64, tpu.core_type = #tpu.core_type<tc>, window_params = [{pipeline_mode = #tpu.pipeline_mode<synchronous>, transform_indices = @transform_0, window_bounds = array<i64: 1, 64>}, {transform_indices = @transform_1, window_bounds = array<i64: 8, 64>}, {transform_indices = @transform_2, window_bounds = array<i64: 8, 64>}]} {
    %c0 = arith.constant 0 : index
    %c0_0 = arith.constant 0 : index
    %0 = vector.load %arg2[%c0, %c0_0] : memref<8x64xf32, #tpu.memory_space<vmem>>, vector<8x64xf32>
    %c0_1 = arith.constant 0 : index
    %c0_2 = arith.constant 0 : index
    %1 = vector.load %arg1[%c0_1, %c0_2] : memref<1x64xf32, #tpu.memory_space<vmem>>, vector<1x64xf32>
    %2 = vector.broadcast %1 : vector<1x64xf32> to vector<8x64xf32>
    %3 = arith.mulf %0, %2 : vector<8x64xf32>
    %c0_3 = arith.constant 0 : index
    %c0_4 = arith.constant 0 : index
    %4 = vector.load %arg3[%c0_3, %c0_4] : memref<8x64xf32, #tpu.memory_space<vmem>>, vector<8x64xf32>
    tpu.vector_store %arg3[%c0_3, %c0_4], %3 {strides = array<i32>} : memref<8x64xf32, #tpu.memory_space<vmem>>, vector<8x64xf32>,
    return
  }
  func.func @transform_0(%arg0: i32) -> (i32, i32) {
    %c0_i32 = arith.constant 0 : i32
    %c0_i32_0 = arith.constant 0 : i32
    %c0_i32_1 = arith.constant 0 : i32
    return %c0_i32, %c0_i32_0 : i32, i32
  }
  func.func @transform_1(%arg0: i32) -> (i32, i32) {
    %c0_i32 = arith.constant 0 : i32
    %c0_i32_0 = arith.constant 0 : i32
    return %arg0, %c0_i32 : i32, i32
  }
  func.func @transform_2(%arg0: i32) -> (i32, i32) {
    %c0_i32 = arith.constant 0 : i32
    %c0_i32_0 = arith.constant 0 : i32
    return %arg0, %c0_i32 : i32, i32
  }
}

</mosaic_0001>

<bundles_post_ra>
// kernel: tpu_custom_call.1
= control target key start
LH: loop header
LB: loop body
LE: loop exit
PB: predicated region body
PF: predicated region fallthrough
CT: control target
= control target key end

     0   :  { %7 = vsyncpa [#allocation3], 0  ;;  %s175_s0 = inlined_call_operand.hbm [shape: f32[1,64], index: 0, kind: input, shape index: {}]   ;;  %s176_s1 = inlined_call_operand.hbm [shape: f32[8,64], index: 1, kind: input, shape index: {}]   ;;  %s177_s2 = inlined_call_operand.hbm [shape: f32[8,64], index: 2, kind: output, shape index: {}]  }
   0x1   :  { %8 = vsyncpa [#allocation6], 0 }
   0x2   :  { %9 = vsyncpa [#allocation4], 0  ;;  %s15_s11 = sshll.u32 %s175_s0, 4  ;;  %s148_s12 = smov [#allocation2]   ;;  %s16_s11 = int_to_ptr.hbm [resolvable:$true] %s15_s11 }
   0x3   :  { %s17_s13 = sshll.u32 %s148_s12, 4  ;;  %s26_s16 = sshll.u32 %s176_s1, 4  ;;  %s18_s13 = int_to_ptr.vmem [resolvable:$true] %s17_s13  ;;  %s27_s16 = int_to_ptr.hbm [resolvable:$true] %s26_s16 }
   0x4   :  { %20 = dma.hbm_to_vmem [thread:$0]  %s16_s11, 16, %s18_s13, [#allocation3]  }
   0x5   :  { %s149_s17 = smov [#allocation5]  }
   0x6   :  { %s28_s18 = sshll.u32 %s149_s17, 4  ;;  %s29_s18 = int_to_ptr.vmem [resolvable:$true] %s28_s18 }
   0x7   :  { %31 = dma.hbm_to_vmem [thread:$0]  %s27_s16, 128, %s29_s18, [#allocation6]  }
   0x8   :  { %142 = dma.done.wait [#allocation3], 16  }
   0x9   :  { %143 = vsyncadd [#allocation3], 4294967280 }
   0xa   :  { %144 = dma.done.wait [#allocation6], 128  }
   0xb   :  { %145 = vsyncadd [#allocation6], 4294967168  ;;  %s150_s19 = smov [#allocation7]   ;;  %s55_s22 = sshll.u32 %s177_s2, 4  ;;  %v40_v0 = vld [vmem:[#allocation5] sm:$0xff]  ;;  %vm46_vm0 = vcmask 523264   ;;  %s56_s22 = int_to_ptr.hbm [resolvable:$true] %s55_s22 }
   0xc   :  { %s53_s0 = sshll.u32 %s150_s19, 4  ;;  %v69_v1 = vld [vmem:[#allocation2] ss:$0 sm:$0xff]  ;;  %s54_s0 = int_to_ptr.vmem [resolvable:$true] %s53_s0 }
   0xd   :  { %v45_v2 = vmul.f32 %v69_v1, %v40_v0 }
   0xf   :  { %47 = vst.msk [vmem:[#allocation7] sm:$0xff] %vm46_vm0, %v45_v2 }
  0x10   :  { %58 = dma.vmem_to_hbm [thread:$0]  %s54_s0, 128, %s56_s22, [#allocation4]  }
  0x11   :  { %146 = dma.done.wait [#allocation4], 128  }
  0x12   :  { %147 = vsyncadd [#allocation4], 4294967168 }
  0x13   :  { %63 = vsyncpa [#allocation3], 1 }
  0x14   :  { %64 = vsyncpa [#allocation6], 1 }
  0x15   :  { %65 = vsyncpa [#allocation4], 1 }

</bundles_post_ra>
